<compile_context>
chip_gen: v7x
topology: tpu7x:2x2x1
jax: 0.10.0
libtpu: 0.0.40
codegen_flags: <defaults>
</compile_context>

<pallas_src>
from typing import NamedTuple, Optional

import jax
import jax.numpy as jnp
from jax.experimental import pallas as pl
from jax.experimental.pallas import tpu as pltpu

WORLD_SIZE = 1  # simulated tensor-parallel degree


def _round_up(a: int, b: int) -> int:
    return ((a + b - 1) // b) * b


# ----------------------------------------------------------------------------
# Tile / VMEM-budget selection
# ----------------------------------------------------------------------------

def _sublane_pack(dtype) -> int:
    itemsize = jnp.dtype(dtype).itemsize
    if itemsize >= 4:
        return 8
    if itemsize == 2:
        return 16
    return 32


def _select_kn_tiles(K: int, N: int, compute_dtype) -> tuple[int, int]:
    """tk/tn depend only on (K, N, dtype) so weight prep can be hoisted."""
    itemsize = jnp.dtype(compute_dtype).itemsize
    tk_base = 512 if itemsize >= 4 else 1024
    tn_base = 512
    tk = min(tk_base, _round_up(K, 128))   # K is lane dim of x, sublane dim of W^T
    tn = min(tn_base, _round_up(N, 128))   # N is lane dim of W^T and of the output
    return tk, tn


def _select_m_tile(M: int, compute_dtype) -> int:
    return min(512, _round_up(M, _sublane_pack(compute_dtype)))


def _vmem_limit_bytes() -> int:
    """Generation-aware scoped-VMEM budget (v5e/v6e: 128 MiB, v7x: 64 MiB)."""
    try:
        cap = int(pltpu.get_tpu_info().vmem_capacity_bytes)
    except Exception:
        cap = 64 * 1024 * 1024  # conservative (v7x-sized) fallback
    budget = cap - 16 * 1024 * 1024              # leave headroom
    return max(32 * 1024 * 1024, min(budget, 110 * 1024 * 1024))


# ----------------------------------------------------------------------------
# Kernels
# ----------------------------------------------------------------------------

def _mm_single_nobias(x_ref, w_ref, o_ref):
    o_ref[...] = jnp.dot(
        x_ref[...], w_ref[...], preferred_element_type=jnp.float32
    ).astype(o_ref.dtype)


def _mm_single_bias(x_ref, w_ref, b_ref, o_ref):
    acc = jnp.dot(x_ref[...], w_ref[...], preferred_element_type=jnp.float32)
    o_ref[...] = (acc + b_ref[...].astype(jnp.float32)).astype(o_ref.dtype)


def _mm_multi_nobias(x_ref, w_ref, o_ref, acc_ref):
    k = pl.program_id(2)

    @pl.when(k == 0)
    def _():
        acc_ref[...] = jnp.zeros_like(acc_ref)

    acc_ref[...] += jnp.dot(
        x_ref[...], w_ref[...], preferred_element_type=jnp.float32
    )

    @pl.when(k == pl.num_programs(2) - 1)
    def _():
        o_ref[...] = acc_ref[...].astype(o_ref.dtype)


def _mm_multi_bias(x_ref, w_ref, b_ref, o_ref, acc_ref):
    k = pl.program_id(2)

    @pl.when(k == 0)
    def _():
        acc_ref[...] = jnp.zeros_like(acc_ref)

    acc_ref[...] += jnp.dot(
        x_ref[...], w_ref[...], preferred_element_type=jnp.float32
    )

    @pl.when(k == pl.num_programs(2) - 1)
    def _():
        o_ref[...] = (
            acc_ref[...] + b_ref[...].astype(jnp.float32)
        ).astype(o_ref.dtype)


# ----------------------------------------------------------------------------
# Weight preparation (one-time per parameter, outside the hot path)
# ----------------------------------------------------------------------------

class PreparedWeight(NamedTuple):
    w_kn: jax.Array        # (Kp, Np) = W.T, cast to compute dtype, tile-padded
    K: int                 # logical input_size_per_partition
    N: int                 # logical output_size
    tk: int
    tn: int
    compute_dtype: jnp.dtype


def prepare_row_parallel_weight(weight, *, compute_dtype=None) -> PreparedWeight:
    """Transpose + cast + pad the (N, K) weight ONCE (hoisted out of forward)."""
    N, K = weight.shape
    if compute_dtype is None:
        compute_dtype = (
            jnp.bfloat16 if weight.dtype == jnp.float32 else weight.dtype
        )
    compute_dtype = jnp.dtype(compute_dtype)
    tk, tn = _select_kn_tiles(K, N, compute_dtype)
    Kp, Np = _round_up(K, tk), _round_up(N, tn)
    w_kn = weight.T.astype(compute_dtype)        # (K, N): lane-dense N for the MXU
    if (Kp, Np) != (K, N):
        w_kn = jnp.pad(w_kn, ((0, Kp - K), (0, Np - N)))
    return PreparedWeight(w_kn, K, N, tk, tn, compute_dtype)


# ----------------------------------------------------------------------------
# Pallas dispatch
# ----------------------------------------------------------------------------

def _pallas_linear(x2, pw: PreparedWeight, bias_row, out_dtype):
    """(x2 @ W^T [+ bias]) with tiled, pipelined Pallas kernels.

    x2: (M, K) already cast to pw.compute_dtype; pw.w_kn: (Kp, Np);
    bias_row: (1, N) f32 or None. Returns (M, N) in out_dtype.
    """
    M, K = x2.shape
    N, tk, tn = pw.N, pw.tk, pw.tn
    Kp, Np = pw.w_kn.shape
    tm = _select_m_tile(M, x2.dtype)
    Mp = _round_up(M, tm)

    xp = jnp.pad(x2, ((0, Mp - M), (0, Kp - K))) if (Mp, Kp) != (M, K) else x2

    has_bias = bias_row is not None
    if has_bias and Np != N:
        bias_row = jnp.pad(bias_row, ((0, 0), (0, Np - N)))

    n_n, n_m, n_k = Np // tn, Mp // tm, Kp // tk

    cost = pl.CostEstimate(
        flops=2 * M * N * K,
        transcendentals=0,
        bytes_accessed=(x2.size * x2.dtype.itemsize
                        + pw.w_kn.size * pw.w_kn.dtype.itemsize
                        + M * N * jnp.dtype(out_dtype).itemsize),
    )
    vmem_limit = _vmem_limit_bytes()

    if n_k == 1:
        # Single reduction step: no accumulator scratch, no K grid axis.
        # TODO(synk): on v7x (2 TCs) small problems with n_n == n_m == 1 leave
        # one core idle; a CORE_PARALLEL split of M/N would fix that.
        if has_bias:
            kernel = _mm_single_bias
            in_specs = [
                pl.BlockSpec((tm, tk), lambda j, i: (i, 0)),
                pl.BlockSpec((tk, tn), lambda j, i: (0, j)),
                pl.BlockSpec((1, tn), lambda j, i: (0, j)),
            ]
            args = (xp, pw.w_kn, bias_row)
        else:
            kernel = _mm_single_nobias
            in_specs = [
                pl.BlockSpec((tm, tk), lambda j, i: (i, 0)),
                pl.BlockSpec((tk, tn), lambda j, i: (0, j)),
            ]
            args = (xp, pw.w_kn)
        out = pl.pallas_call(
            kernel,
            out_shape=jax.ShapeDtypeStruct((Mp, Np), out_dtype),
            grid_spec=pltpu.PrefetchScalarGridSpec(
                num_scalar_prefetch=0,
                grid=(n_n, n_m),
                in_specs=in_specs,
                out_specs=pl.BlockSpec((tm, tn), lambda j, i: (i, j)),
            ),
            compiler_params=pltpu.CompilerParams(
                dimension_semantics=("parallel", "parallel"),
                vmem_limit_bytes=vmem_limit,
            ),
            cost_estimate=cost,
        )(*args)
    else:
        # Multi-step reduction: f32 VMEM accumulator resident across K.
        if has_bias:
            kernel = _mm_multi_bias
            in_specs = [
                pl.BlockSpec((tm, tk), lambda j, i, k: (i, k)),
                pl.BlockSpec((tk, tn), lambda j, i, k: (k, j)),
                pl.BlockSpec((1, tn), lambda j, i, k: (0, j)),
            ]
            args = (xp, pw.w_kn, bias_row)
        else:
            kernel = _mm_multi_nobias
            in_specs = [
                pl.BlockSpec((tm, tk), lambda j, i, k: (i, k)),
                pl.BlockSpec((tk, tn), lambda j, i, k: (k, j)),
            ]
            args = (xp, pw.w_kn)
        out = pl.pallas_call(
            kernel,
            out_shape=jax.ShapeDtypeStruct((Mp, Np), out_dtype),
            grid_spec=pltpu.PrefetchScalarGridSpec(
                num_scalar_prefetch=0,
                grid=(n_n, n_m, n_k),  # K innermost (reduction)
                in_specs=in_specs,
                out_specs=pl.BlockSpec((tm, tn), lambda j, i, k: (i, j)),
                scratch_shapes=[pltpu.VMEM((tm, tn), jnp.float32)],
            ),
            compiler_params=pltpu.CompilerParams(
                dimension_semantics=("parallel", "parallel", "arbitrary"),
                vmem_limit_bytes=vmem_limit,
            ),
            cost_estimate=cost,
        )(*args)

    if (Mp, Np) != (M, N):
        out = out[:M, :N]
    return out


# ----------------------------------------------------------------------------
# Module-equivalent forward
# ----------------------------------------------------------------------------

def row_parallel_linear(x, weight=None, bias=None, input_is_parallel=False,
                        skip_bias_add=False, *, prepared_weight=None,
                        compute_dtype=None, force_pallas=False):
    """Forward pass of RowParallelLinear (world_size == 1).

    Returns (output, output_bias) exactly like the PyTorch module. For best
    performance, call prepare_row_parallel_weight(weight) once and pass it via
    prepared_weight= (hoists transpose/pad/cast out of the hot path).
    """
    # scatter_to_tensor_model_parallel_region: identity at world_size == 1.
    input_parallel = x  # (input_is_parallel only matters for world_size > 1)

    if prepared_weight is None:
        assert weight is not None, "need weight or prepared_weight"
        prepared_weight = prepare_row_parallel_weight(
            weight, compute_dtype=compute_dtype)
    pw = prepared_weight
    K, N = pw.K, pw.N

    *lead, Kx = input_parallel.shape
    assert Kx == K, f"input last dim {Kx} != weight K {K}"
    M = 1
    for d in lead:
        M *= int(d)

    out_dtype = x.dtype
    x2 = input_parallel.reshape(M, K).astype(pw.compute_dtype)

    add_bias = (not skip_bias_add) and (bias is not None)
    bias_row = bias.reshape(1, N).astype(jnp.float32) if add_bias else None

    flops = 2 * M * N * K
    if force_pallas or flops >= (1 << 22):
        out2 = _pallas_linear(x2, pw, bias_row, out_dtype)
    else:
        # Tiny problem: pallas_call launch/step overhead dominates; use XLA dot.
        out2 = jnp.dot(x2, pw.w_kn[:K, :N], preferred_element_type=jnp.float32)
        if add_bias:
            out2 = out2 + bias_row
        out2 = out2.astype(out_dtype)

    # reduce_from_tensor_model_parallel_region: identity at world_size == 1.
    output_ = out2.reshape(*lead, N)

    if not skip_bias_add:
        output = output_          # bias (if any) already fused in the epilogue
        output_bias = None
    else:
        output = output_
        output_bias = bias
    return output, output_bias


if __name__ == "__main__":
    batch, seq = 2, 8
    input_size, output_size = 32, 64
    input_size_per_partition = input_size // WORLD_SIZE

    key = jax.random.PRNGKey(0)
    kx, kw, kb = jax.random.split(key, 3)

    x = jax.random.normal(kx, (batch, seq, input_size_per_partition),
                          dtype=jnp.float32)
    # torch.empty weights are undefined -> deterministic random init here.
    weight = jax.random.normal(kw, (output_size, input_size_per_partition),
                               dtype=jnp.float32) * 0.02
    # Module zero-inits the bias; use a nonzero bias to exercise the fused add.
    bias = jax.random.normal(kb, (output_size,), dtype=jnp.float32) * 0.1

    ref_b = jnp.einsum("bsk,nk->bsn", x, weight) + bias
    ref_nb = jnp.einsum("bsk,nk->bsn", x, weight)

    # --- exact-precision check: opt out of bf16 (compute_dtype=f32) ----------
    pw_f32 = prepare_row_parallel_weight(weight, compute_dtype=jnp.float32)
    out, out_bias = row_parallel_linear(
        x, bias=bias, prepared_weight=pw_f32,
        input_is_parallel=False, skip_bias_add=False, force_pallas=True)
    out = jax.block_until_ready(out)
    assert out.shape == (batch, seq, output_size)
    assert out_bias is None
    assert jnp.allclose(out, ref_b, atol=1e-5, rtol=1e-5)

    out2, out_bias2 = row_parallel_linear(
        x, bias=bias, prepared_weight=pw_f32,
        skip_bias_add=True, force_pallas=True)
    out2 = jax.block_until_ready(out2)
    assert jnp.allclose(out2, ref_nb, atol=1e-5, rtol=1e-5)
    assert out_bias2 is not None and jnp.allclose(out_bias2, bias)

    # --- default (bf16 MXU compute, f32 accumulation) path --------------------
    pw_bf16 = prepare_row_parallel_weight(weight)           # defaults to bf16
    out3, out_bias3 = row_parallel_linear(
        x, bias=bias, prepared_weight=pw_bf16,
        input_is_parallel=False, skip_bias_add=False, force_pallas=True)
    out3 = jax.block_until_ready(out3)
    assert out3.shape == (batch, seq, output_size)
    assert out_bias3 is None
    assert jnp.allclose(out3, ref_b, atol=3e-2, rtol=3e-2)   # bf16 tolerance

    print("KERNEL_OK")
</pallas_src>

<mosaic_0001>
module attributes {stable_mosaic.version = 11 : i64} {
  func.func @_mm_single_bias(%arg0: i32, %arg1: i32, %arg2: memref<16x128xf32, #tpu.memory_space<vmem>>, %arg3: memref<128x128xf32, #tpu.memory_space<vmem>>, %arg4: memref<1x128xf32, #tpu.memory_space<vmem>>, %arg5: memref<16x128xf32, #tpu.memory_space<vmem>>) attributes {dimension_semantics = [#tpu.dimension_semantics<parallel>, #tpu.dimension_semantics<parallel>], iteration_bounds = array<i64: 1, 1>, scalar_prefetch = 0 : i64, scratch_operands = 0 : i64, tpu.core_type = #tpu.core_type<tc>, window_params = [{transform_indices = @transform_0, window_bounds = array<i64: 16, 128>}, {transform_indices = @transform_1, window_bounds = array<i64: 128, 128>}, {transform_indices = @transform_2, window_bounds = array<i64: 1, 128>}, {transform_indices = @transform_3, window_bounds = array<i64: 16, 128>}]} {
    %c0 = arith.constant 0 : index
    %c0_0 = arith.constant 0 : index
    %0 = vector.load %arg2[%c0, %c0_0] : memref<16x128xf32, #tpu.memory_space<vmem>>, vector<16x128xf32>
    %c0_1 = arith.constant 0 : index
    %c0_2 = arith.constant 0 : index
    %1 = vector.load %arg3[%c0_1, %c0_2] : memref<128x128xf32, #tpu.memory_space<vmem>>, vector<128x128xf32>
    %cst = arith.constant dense<0.000000e+00> : vector<16x128xf32>
    %2 = tpu.matmul %0, %1, %cst {dimension_numbers = #tpu.dot_dimension_numbers<[1], [0], [0], [1], [0, 0, 1, 1], [], []>} : vector<16x128xf32>, vector<128x128xf32>, vector<16x128xf32> -> vector<16x128xf32>
    %c0_3 = arith.constant 0 : index
    %c0_4 = arith.constant 0 : index
    %3 = vector.load %arg4[%c0_3, %c0_4] : memref<1x128xf32, #tpu.memory_space<vmem>>, vector<1x128xf32>
    %4 = vector.broadcast %3 : vector<1x128xf32> to vector<16x128xf32>
    %5 = arith.addf %2, %4 : vector<16x128xf32>
    %c0_5 = arith.constant 0 : index
    %c0_6 = arith.constant 0 : index
    %6 = vector.load %arg5[%c0_5, %c0_6] : memref<16x128xf32, #tpu.memory_space<vmem>>, vector<16x128xf32>
    tpu.vector_store %arg5[%c0_5, %c0_6], %5 {strides = array<i32>} : memref<16x128xf32, #tpu.memory_space<vmem>>, vector<16x128xf32>,
    return
  }
  func.func @transform_0(%arg0: i32, %arg1: i32) -> (i32, i32) {
    %c0_i32 = arith.constant 0 : i32
    %c0_i32_0 = arith.constant 0 : i32
    return %arg1, %c0_i32 : i32, i32
  }
  func.func @transform_1(%arg0: i32, %arg1: i32) -> (i32, i32) {
    %c0_i32 = arith.constant 0 : i32
    %c0_i32_0 = arith.constant 0 : i32
    return %c0_i32, %arg0 : i32, i32
  }
  func.func @transform_2(%arg0: i32, %arg1: i32) -> (i32, i32) {
    %c0_i32 = arith.constant 0 : i32
    %c0_i32_0 = arith.constant 0 : i32
    return %c0_i32, %arg0 : i32, i32
  }
  func.func @transform_3(%arg0: i32, %arg1: i32) -> (i32, i32) {
    %c0_i32 = arith.constant 0 : i32
    return %arg1, %arg0 : i32, i32
  }
}

</mosaic_0001>

<bundles_post_ra>
// kernel: tpu_custom_call.1
= control target key start
LH: loop header
LB: loop body
LE: loop exit
PB: predicated region body
PF: predicated region fallthrough
CT: control target
= control target key end

     0   :  { %8 = vsyncpa [#allocation3], 0  ;;  %s399_s0 = inlined_call_operand.hbm [shape: f32[16,128], index: 0, kind: input, shape index: {}]   ;;  %s400_s1 = inlined_call_operand.hbm [shape: f32[128,128], index: 1, kind: input, shape index: {}]   ;;  %s401_s2 = inlined_call_operand.vmem [shape: f32[1,128], index: 2, kind: input, shape index: {}]   ;;  %s402_s3 = inlined_call_operand.hbm [shape: f32[16,128], index: 3, kind: output, shape index: {}]  }
   0x1   :  { %9 = vsyncpa [#allocation6], 0 }
   0x2   :  { %10 = vsyncpa [#allocation4], 0  ;;  %s326_s12 = smov [#allocation2]   ;;  %s254_s16 = scalar_lea.hbm %s399_s0, 256 }
   0x3   :  { %s16_s13 = sshll.u32 %s326_s12, 4  ;;  %p255_p0 = scmp.ne.s32.totalorder %s399_s0, %s254_s16  ;;  %s17_s13 = int_to_ptr.vmem [resolvable:$true] %s16_s13 }
   0x4   :  { %p258_p1 = scmp.lt.u32.totalorder %s254_s16, %s399_s0 }
   0x6   :  { %p260_p2 = pnand %p258_p1, %p255_p0 }
   0x8   :  { %263 = shalt.err (!%p260_p2)
}
   0x9   :  { %s264_s21 = scalar_lea.vmem %s17_s13, 256  ;;  %p269_p4 = scmp.lt.s32.totalorder %s17_s13, %s17_s13 }
   0xa   :  { %p265_p3 = scmp.ne.s32.totalorder %s17_s13, %s264_s21  ;;  %p270_p5 = scmp.lt.s32.totalorder %s264_s21, %s264_s21 }
   0xc   :  { %p271_p6 = por %p270_p5, %p269_p4 }
   0xe   :  { %p272_p7 = pnand %p271_p6, %p265_p3 }
  0x10   :  { %275 = shalt.err (!%p272_p7)
}
  0x11   :  { %s327_s22 = smov 128   ;;  %s328_s23 = smov 8  }
  0x12   :  { %22 = dma.hbm_to_vmem [thread:$0]  %s399_s0, 256, %s17_s13, [#allocation3], %s327_s22, %s327_s22, %s328_s23  }
  0x13   :  { %s329_s26 = smov [#allocation5]   ;;  %s276_s30 = scalar_lea.hbm %s400_s1, 2048 }
  0x14   :  { %s28_s27 = sshll.u32 %s329_s26, 4  ;;  %p277_p8 = scmp.ne.s32.totalorder %s400_s1, %s276_s30  ;;  %s29_s27 = int_to_ptr.vmem [resolvable:$true] %s28_s27 }
  0x15   :  { %p280_p9 = scmp.lt.u32.totalorder %s276_s30, %s400_s1 }
  0x17   :  { %p282_p10 = pnand %p280_p9, %p277_p8 }
  0x19   :  { %285 = shalt.err (!%p282_p10)
}
  0x1a   :  { %s286_s8 = scalar_lea.vmem %s29_s27, 2048  ;;  %p291_p12 = scmp.lt.s32.totalorder %s29_s27, %s29_s27 }
  0x1b   :  { %p287_p11 = scmp.ne.s32.totalorder %s29_s27, %s286_s8  ;;  %p292_p13 = scmp.lt.s32.totalorder %s286_s8, %s286_s8 }
  0x1d   :  { %p293_p0 = por %p292_p13, %p291_p12 }
  0x1f   :  { %p294_p1 = pnand %p293_p0, %p287_p11 }
  0x21   :  { %297 = shalt.err (!%p294_p1)
}
  0x22   :  { %34 = dma.hbm_to_vmem [thread:$0]  %s400_s1, 2048, %s29_s27, [#allocation6], %s327_s22, %s327_s22, %s328_s23  }
  0x23   :  { %320 = dma.done.wait [#allocation3], 256  }
  0x24   :  { %321 = vsyncadd [#allocation3], 4294967040 }
  0x25   :  { %322 = dma.done.wait [#allocation6], 2048  }
  0x26   :  { %323 = vsyncadd [#allocation6], 4294965248  ;;  %v45_v0 = vld [vmem:[#allocation5] sm:$0xff]  ;;  %v46_v1 = vld [vmem:[#allocation5 + $0x8] sm:$0xff]  ;;  %s330_s11 = smov [#allocation7]  }
  0x27   :  { %v47_v2 = vld [vmem:[#allocation5 + $0x10] sm:$0xff]  ;;  %v217_v3 = vpack.c.bf16 %v46_v1, %v45_v0  ;;  %v48_v4 = vld [vmem:[#allocation5 + $0x18] sm:$0xff]  ;;  %v49_v6 = vld [vmem:[#allocation5 + $0x20] sm:$0xff]  ;;  %s150_s12 = sshll.u32 %s330_s11, 4  ;;  %s151_s12 = int_to_ptr.vmem [resolvable:$true] %s150_s12 }
  0x28   :  { %v221_v5 = vpack.c.bf16 %v48_v4, %v47_v2  ;;  %v50_v7 = vld [vmem:[#allocation5 + $0x28] sm:$0xff]  ;;  %v43_v9 = vld [vmem:[#allocation2] sm:$0xff]  ;;  %v52_v11 = vld [vmem:[#allocation5 + $0x38] sm:$0xff]  ;;  %s298_s13 = scalar_lea.vmem %s151_s12, 256  ;;  %p303_p3 = scmp.lt.s32.totalorder %s151_s12, %s151_s12 }
  0x29   :  { %218 = vmatprep.subr.bf16.mxu0 %v217_v3  ;;  %v225_v8 = vpack.c.bf16 %v50_v7, %v49_v6  ;;  %v51_v10 = vld [vmem:[#allocation5 + $0x30] sm:$0xff]  ;;  %214 = vmatprep.mubr.f32.mxu0 %v43_v9  ;;  %v53_v13 = vld [vmem:[#allocation5 + $0x40] sm:$0xff]  ;;  %v54_v14 = vld [vmem:[#allocation5 + $0x48] sm:$0xff]  ;;  %p299_p2 = scmp.ne.s32.totalorder %s151_s12, %s298_s13  ;;  %p304_p4 = scmp.lt.s32.totalorder %s298_s13, %s298_s13 }
  0x2a   :  { %220 = vmatpush3.bf16.msra.mxu0 %v217_v3  ;;  %v229_v12 = vpack.c.bf16 %v52_v11, %v51_v10  ;;  %v233_v15 = vpack.c.bf16 %v54_v14, %v53_v13  ;;  %v55_v16 = vld [vmem:[#allocation5 + $0x50] sm:$0xff]  ;;  %v56_v17 = vld [vmem:[#allocation5 + $0x58] sm:$0xff]  ;;  %v57_v19 = vld [vmem:[#allocation5 + $0x60] sm:$0xff] }
  0x2b   :  { %222 = vmatprep.subr.bf16.mxu0 %v221_v5  ;;  %v237_v18 = vpack.c.bf16 %v56_v17, %v55_v16  ;;  %v58_v20 = vld [vmem:[#allocation5 + $0x68] sm:$0xff]  ;;  %v59_v22 = vld [vmem:[#allocation5 + $0x70] sm:$0xff]  ;;  %v60_v23 = vld [vmem:[#allocation5 + $0x78] sm:$0xff]  ;;  %p305_p5 = por %p304_p4, %p303_p3 }
  0x2c   :  { %v241_v21 = vpack.c.bf16 %v58_v20, %v57_v19  ;;  %v245_v24 = vpack.c.bf16 %v60_v23, %v59_v22  ;;  %v44_v25 = vld [vmem:[#allocation2 + $0x8] sm:$0xff]  ;;  %v163_v26 = vld [vmem:[%s401_s2] ss:$0 sm:$0xff] }
  0x2d   :  { %p306_p6 = pnand %p305_p5, %p299_p2 }
  0x2e   :  { %224 = vmatpush3.bf16.msra.mxu0 %v221_v5 }
  0x2f   :  { %226 = vmatprep.subr.bf16.mxu0 %v225_v8 }
  0x32   :  { %228 = vmatpush3.bf16.msra.mxu0 %v225_v8 }
  0x33   :  { %230 = vmatprep.subr.bf16.mxu0 %v229_v12 }
  0x36   :  { %232 = vmatpush3.bf16.msra.mxu0 %v229_v12 }
  0x37   :  { %234 = vmatprep.subr.bf16.mxu0 %v233_v15 }
  0x3a   :  { %236 = vmatpush3.bf16.msra.mxu0 %v233_v15 }
  0x3b   :  { %238 = vmatprep.subr.bf16.mxu0 %v237_v18 }
  0x3e   :  { %240 = vmatpush3.bf16.msra.mxu0 %v237_v18 }
  0x3f   :  { %242 = vmatprep.subr.bf16.mxu0 %v241_v21 }
  0x42   :  { %244 = vmatpush3.bf16.msra.mxu0 %v241_v21 }
  0x43   :  { %246 = vmatprep.subr.bf16.mxu0 %v245_v24 }
  0x46   :  { %248 = vmatpush3.bf16.msra.mxu0 %v245_v24 }
  0x49   :  { %215 = vmatmul.mubr.f32.vlgmr.msra.gmra.mrb[0].mxu0 %v44_v25 }
 0x11c   :  { %v216_v27 = vpop.f32.mrb[0].mxu0 }
 0x11d   :  { %v140_v28 = vadd.f32 %v216_v27, %v163_v26  ;;  %v134_v29 = vpop.f32.mrb[1].mxu0 }
 0x11e   :  { %v135_v30 = vadd.f32 %v163_v26, %v134_v29 }
 0x11f   :  { %144 = vst [vmem:[#allocation7 + $0x8] sm:$0xff] %v140_v28 }
 0x120   :  { %143 = vst [vmem:[#allocation7] sm:$0xff] %v135_v30 }
 0x121   :  { %309 = shalt.err (!%p306_p6)
}
 0x122   :  { %s310_s2 = scalar_lea.hbm %s402_s3, 256 }
 0x123   :  { %p311_p7 = scmp.ne.s32.totalorder %s402_s3, %s310_s2  ;;  %p314_p8 = scmp.lt.u32.totalorder %s310_s2, %s402_s3 }
 0x125   :  { %p316_p9 = pnand %p314_p8, %p311_p7 }
 0x127   :  { %319 = shalt.err (!%p316_p9)
}
 0x128   :  { %156 = dma.vmem_to_hbm [thread:$0]  %s151_s12, 256, %s402_s3, [#allocation4], %s327_s22, %s327_s22, %s328_s23  }
 0x129   :  { %324 = dma.done.wait [#allocation4], 256  }
 0x12a   :  { %325 = vsyncadd [#allocation4], 4294967040 }
 0x12b   :  { %160 = vsyncpa [#allocation3], 1 }
 0x12c   :  { %161 = vsyncpa [#allocation6], 1 }
 0x12d   :  { %162 = vsyncpa [#allocation4], 1 }

</bundles_post_ra>
